<compile_context>
chip_gen: v7x
topology: tpu7x:2x2x1
jax: 0.10.0
libtpu: 0.0.40
codegen_flags: <defaults>
</compile_context>

<pallas_src>
import math

import jax
import jax.numpy as jnp
from jax import lax
from jax.experimental import pallas as pl
from jax.experimental.pallas import tpu as pltpu


def _attention_kernel(att_ref, w_ref, b_ref, x_ref, o_ref):
    att = att_ref[...].astype(jnp.float32)   # (1, D_in)
    w = w_ref[...].astype(jnp.float32)       # (D_out, D_in)  (untransposed torch layout)
    b = b_ref[...].astype(jnp.float32)       # (1, D_out)
    x = x_ref[...].astype(jnp.float32)       # (N, D_out)

    # Linear: v[0, j] = sum_k att[0, k] * W[j, k] + b[j]
    # Contract D_in of both operands directly (no explicit transpose) -> lane-dense (1, D_out).
    v = lax.dot_general(
        att, w, (((1,), (1,)), ((), ())),
        preferred_element_type=jnp.float32,
    ) + b                                                       # (1, D_out)

    # Per-row scores: s[i] = dot(v, x[i])  -- VPU broadcast-multiply + lane reduce (no MXU).
    s = jnp.sum(x * v, axis=1, keepdims=True)                   # (N, 1)

    # Numerically stable softmax over the N stacked scores.
    m = jnp.max(s, axis=0, keepdims=True)                       # (1, 1)
    e = jnp.exp(s - m)                                          # (N, 1)  (EUP)
    inv = pl.reciprocal(jnp.sum(e, axis=0, keepdims=True), approx=True)
    a = e * inv                                                 # (N, 1)

    # Weighted sum of inputs: VPU broadcast-multiply + sublane reduce -> lane-dense (1, D_out).
    o_ref[...] = jnp.sum(a * x, axis=0, keepdims=True).astype(o_ref.dtype)


def attention_forward(att_val, x, weight, bias):
    """att_val: (1, D_in); x: (N, D_out); weight: (D_out, D_in); bias: (D_out,)."""
    d_in = att_val.shape[-1]
    n, d_out = x.shape
    att2 = att_val.reshape(1, d_in)      # free reshape (no transpose, no cast)
    b2 = bias.reshape(1, d_out)          # free reshape (no transpose, no cast)

    vmem = pltpu.MemorySpace.VMEM
    out = pl.pallas_call(
        _attention_kernel,
        out_shape=jax.ShapeDtypeStruct((1, d_out), jnp.float32),
        in_specs=[
            pl.BlockSpec(memory_space=vmem),   # att_val (1, D_in)
            pl.BlockSpec(memory_space=vmem),   # weight  (D_out, D_in)
            pl.BlockSpec(memory_space=vmem),   # bias    (1, D_out)
            pl.BlockSpec(memory_space=vmem),   # x       (N, D_out)
        ],
        out_specs=pl.BlockSpec(memory_space=vmem),
    )(att2, weight, b2, x)
    # torch returns a (D_out,) vector
    return out.reshape(d_out)


if __name__ == "__main__":
    D_IN, D_OUT, N = 32, 32, 8

    key = jax.random.PRNGKey(0)
    kw, kb, ka, kx = jax.random.split(key, 4)

    # Deterministic parameter init mirroring the module's __init__:
    # kaiming_uniform(nonlinearity='leaky_relu') -> bound = sqrt(2) * sqrt(3 / fan_in)
    w_bound = math.sqrt(2.0) * math.sqrt(3.0 / D_IN)
    weight = jax.random.uniform(kw, (D_OUT, D_IN), minval=-w_bound, maxval=w_bound,
                                dtype=jnp.float32)
    # nn.Linear default bias init: U(-1/sqrt(fan_in), 1/sqrt(fan_in))
    b_bound = 1.0 / math.sqrt(D_IN)
    bias = jax.random.uniform(kb, (D_OUT,), minval=-b_bound, maxval=b_bound, dtype=jnp.float32)

    att_val = jax.random.normal(ka, (1, D_IN), dtype=jnp.float32)   # query vector (batch dim = 1)
    x = jax.random.normal(kx, (N, D_OUT), dtype=jnp.float32)        # stacked list of N inputs

    out = attention_forward(att_val, x, weight, bias)
    out = jax.block_until_ready(out)

    # Pure-JAX reference check of the same semantics.
    v_ref = (att_val @ weight.T + bias).reshape(-1)
    scores_ref = x @ v_ref
    a_ref = jax.nn.softmax(scores_ref)
    ref = (a_ref[:, None] * x).sum(axis=0)
    assert out.shape == (D_OUT,)
    # Tolerance loosened slightly because the softmax denominator uses the
    # EUP approximate reciprocal (pl.reciprocal(..., approx=True)).
    assert jnp.allclose(out, ref, atol=1e-2, rtol=1e-2), "mismatch vs reference"

    print("KERNEL_OK")
</pallas_src>

<mosaic_0001>
module attributes {stable_mosaic.version = 11 : i64} {
  func.func @_attention_kernel(%arg0: memref<1x32xf32, #tpu.memory_space<vmem>>, %arg1: memref<32x32xf32, #tpu.memory_space<vmem>>, %arg2: memref<1x32xf32, #tpu.memory_space<vmem>>, %arg3: memref<8x32xf32, #tpu.memory_space<vmem>>, %arg4: memref<1x32xf32, #tpu.memory_space<vmem>>) attributes {dimension_semantics = [], scalar_prefetch = 0 : i64, scratch_operands = 0 : i64, tpu.core_type = #tpu.core_type<tc>} {
    %c0 = arith.constant 0 : index
    %c0_0 = arith.constant 0 : index
    %0 = vector.load %arg0[%c0, %c0_0] : memref<1x32xf32, #tpu.memory_space<vmem>>, vector<1x32xf32>
    %c0_1 = arith.constant 0 : index
    %c0_2 = arith.constant 0 : index
    %1 = vector.load %arg1[%c0_1, %c0_2] : memref<32x32xf32, #tpu.memory_space<vmem>>, vector<32x32xf32>
    %c0_3 = arith.constant 0 : index
    %c0_4 = arith.constant 0 : index
    %2 = vector.load %arg2[%c0_3, %c0_4] : memref<1x32xf32, #tpu.memory_space<vmem>>, vector<1x32xf32>
    %c0_5 = arith.constant 0 : index
    %c0_6 = arith.constant 0 : index
    %3 = vector.load %arg3[%c0_5, %c0_6] : memref<8x32xf32, #tpu.memory_space<vmem>>, vector<8x32xf32>
    %cst = arith.constant dense<0.000000e+00> : vector<1x32xf32>
    %4 = tpu.matmul %0, %1, %cst {dimension_numbers = #tpu.dot_dimension_numbers<[1], [1], [0], [0], [0, 0, 1, 0], [], []>} : vector<1x32xf32>, vector<32x32xf32>, vector<1x32xf32> -> vector<1x32xf32>
    %5 = arith.addf %4, %2 : vector<1x32xf32>
    %6 = vector.broadcast %5 : vector<1x32xf32> to vector<8x32xf32>
    %7 = arith.mulf %3, %6 : vector<8x32xf32>
    %cst_7 = arith.constant dense<0.000000e+00> : vector<8xf32>
    %8 = vector.multi_reduction <add>, %7, %cst_7 [1] : vector<8x32xf32> to vector<8xf32>
    %9 = vector.shape_cast %8 : vector<8xf32> to vector<8x1xf32>
    %cst_8 = arith.constant dense<0xFF800000> : vector<1xf32>
    %10 = vector.multi_reduction <maximumf>, %9, %cst_8 [0] : vector<8x1xf32> to vector<1xf32>
    %11 = vector.shape_cast %10 : vector<1xf32> to vector<1x1xf32>
    %12 = vector.broadcast %11 : vector<1x1xf32> to vector<8x1xf32>
    %13 = arith.subf %9, %12 : vector<8x1xf32>
    %14 = math.exp %13 : vector<8x1xf32>
    %cst_9 = arith.constant dense<0.000000e+00> : vector<1xf32>
    %15 = vector.multi_reduction <add>, %14, %cst_9 [0] : vector<8x1xf32> to vector<1xf32>
    %16 = vector.shape_cast %15 : vector<1xf32> to vector<1x1xf32>
    %17 = tpu.reciprocal %16 {approx = true} : vector<1x1xf32> -> vector<1x1xf32>
    %18 = vector.broadcast %17 : vector<1x1xf32> to vector<8x1xf32>
    %19 = arith.mulf %14, %18 : vector<8x1xf32>
    %20 = vector.broadcast %19 : vector<8x1xf32> to vector<8x32xf32>
    %21 = arith.mulf %20, %3 : vector<8x32xf32>
    %cst_10 = arith.constant dense<0.000000e+00> : vector<32xf32>
    %22 = vector.multi_reduction <add>, %21, %cst_10 [0] : vector<8x32xf32> to vector<32xf32>
    %23 = vector.shape_cast %22 : vector<32xf32> to vector<1x32xf32>
    %c0_11 = arith.constant 0 : index
    %c0_12 = arith.constant 0 : index
    %24 = vector.load %arg4[%c0_11, %c0_12] : memref<1x32xf32, #tpu.memory_space<vmem>>, vector<1x32xf32>
    tpu.vector_store %arg4[%c0_11, %c0_12], %23 {strides = array<i32>} : memref<1x32xf32, #tpu.memory_space<vmem>>, vector<1x32xf32>,
    return
  }
}

</mosaic_0001>

<bundles_post_ra>
// kernel: tpu_custom_call.1
= control target key start
LH: loop header
LB: loop body
LE: loop exit
PB: predicated region body
PF: predicated region fallthrough
CT: control target
= control target key end

     0   :  { %9 = vsyncpa [#allocation3], 0  ;;  %s388_s0 = inlined_call_operand.hbm [shape: f32[1,32], index: 0, kind: input, shape index: {}]   ;;  %s389_s1 = inlined_call_operand.hbm [shape: f32[32,32], index: 1, kind: input, shape index: {}]   ;;  %s390_s2 = inlined_call_operand.vmem [shape: f32[1,32], index: 2, kind: input, shape index: {}]   ;;  %s391_s3 = inlined_call_operand.vmem [shape: f32[8,32], index: 3, kind: input, shape index: {}]   ;;  %s392_s4 = inlined_call_operand.hbm [shape: f32[1,32], index: 4, kind: output, shape index: {}]  }
   0x1   :  { %10 = vsyncpa [#allocation6], 0 }
   0x2   :  { %11 = vsyncpa [#allocation4], 0  ;;  %s301_s15 = smov [#allocation2]   ;;  %s302_s17 = smov [#allocation5]  }
   0x3   :  { %s18_s16 = sshll.u32 %s301_s15, 4  ;;  %s27_s18 = sshll.u32 %s302_s17, 4  ;;  %s19_s16 = int_to_ptr.vmem [resolvable:$true] %s18_s16  ;;  %s334_s18 = int_to_ptr.vmem [resolvable:$true] %s27_s18 }
   0x4   :  { %s229_s21 = scalar_lea.hbm %s388_s0, 16 }
   0x5   :  { %p230_p0 = scmp.ne.s32.totalorder %s388_s0, %s229_s21  ;;  %p233_p1 = scmp.lt.u32.totalorder %s229_s21, %s388_s0 }
   0x7   :  { %p235_p2 = pnand %p233_p1, %p230_p0 }
   0x9   :  { %238 = shalt.err (!%p235_p2)
}
   0xa   :  { %s239_s26 = scalar_lea.vmem %s19_s16, 16  ;;  %s243_s27 = scalar_lea.vmem %s19_s16, 32 }
   0xb   :  { %p240_p3 = scmp.ne.s32.totalorder %s19_s16, %s239_s26  ;;  %p244_p4 = scmp.lt.s32.totalorder %s19_s16, %s19_s16 }
   0xc   :  { %p245_p5 = scmp.lt.s32.totalorder %s243_s27, %s239_s26 }
   0xe   :  { %p246_p6 = por %p245_p5, %p244_p4 }
  0x10   :  { %p247_p7 = pnand %p246_p6, %p240_p3 }
  0x12   :  { %250 = shalt.err (!%p247_p7)
}
  0x13   :  { %21 = dma.hbm_to_vmem [thread:$0]  %s388_s0, 16, %s19_s16, [#allocation3]  }
  0x14   :  { %s251_s6 = scalar_lea.hbm %s389_s1, 512 }
  0x15   :  { %p252_p8 = scmp.ne.s32.totalorder %s389_s1, %s251_s6  ;;  %p255_p9 = scmp.lt.u32.totalorder %s251_s6, %s389_s1 }
  0x17   :  { %p257_p10 = pnand %p255_p9, %p252_p8 }
  0x19   :  { %260 = shalt.err (!%p257_p10)
}
  0x1a   :  { %s261_s11 = scalar_lea.vmem %s334_s18, 512  ;;  %p266_p12 = scmp.lt.s32.totalorder %s334_s18, %s334_s18 }
  0x1b   :  { %p262_p11 = scmp.ne.s32.totalorder %s334_s18, %s261_s11  ;;  %p267_p13 = scmp.lt.s32.totalorder %s261_s11, %s261_s11 }
  0x1d   :  { %p268_p0 = por %p267_p13, %p266_p12 }
  0x1f   :  { %p269_p1 = pnand %p268_p0, %p262_p11 }
  0x21   :  { %272 = shalt.err (!%p269_p1)
}
  0x22   :  { %s303_s0 = smov 128   ;;  %s304_s12 = smov 8  }
  0x23   :  { %33 = dma.hbm_to_vmem [thread:$0]  %s389_s1, 512, %s334_s18, [#allocation6], %s303_s0, %s303_s0, %s304_s12  }
  0x24   :  { %295 = dma.done.wait [#allocation3], 16  }
  0x25   :  { %296 = vsyncadd [#allocation3], 4294967280 }
  0x26   :  { %297 = dma.done.wait [#allocation6], 512  }
  0x27   :  { %298 = vsyncadd [#allocation6], 4294966784  ;;  %v305_v0 = vmov 0.0|0.0   ;;  %vm306_vm0 = vmmov 0   ;;  %v307_v1 = vmov 0.0   ;;  %vm51_vm1 = vcmask 261120  }
  0x28   :  { %209 = vmatprep.subr.bf16.mxu0 %v305_v0  ;;  %206 = vmatprep.mubr.msk.f32.mxu0 %vm306_vm0, %v307_v1  ;;  %v45_v2 = vld [vmem:[#allocation5] sm:$0xff]  ;;  %v46_v3 = vld [vmem:[#allocation5 + $0x8] sm:$0xff]  ;;  %vm211_vm2 = vmpackc.low %vm51_vm1, %vm51_vm1  ;;  %v137_v9 = vlaneseq  ;;  %vm170_vm3 = vcmask 253952  }
  0x29   :  { %v210_v4 = vpack.c.bf16 %v46_v3, %v45_v2  ;;  %v47_v5 = vld [vmem:[#allocation5 + $0x10] sm:$0xff]  ;;  %v48_v6 = vld [vmem:[#allocation5 + $0x18] sm:$0xff] }
  0x2a   :  { %v214_v7 = vpack.c.bf16 %v48_v6, %v47_v5  ;;  %v44_v8 = vld [vmem:[#allocation2] sm:$0x1]  ;;  %v138_v10 = vshrl.u32 %v137_v9, 7  ;;  %v49_v11 = vld [vmem:[%s390_s2] sm:$0x1]  ;;  %s308_s2 = smov [#allocation7]  }
  0x2b   :  { %212 = vmatpush3.bf16.xpose.msk.msra.mxu0 %vm211_vm2, %v210_v4  ;;  %v50_v16 = vld [vmem:[%s391_s3] sm:$0xff]  ;;  %s178_s3 = sshll.u32 %s308_s2, 4  ;;  %s179_s3 = int_to_ptr.vmem [resolvable:$true] %s178_s3 }
  0x2c   :  { %213 = vmatprep.subr.bf16.mxu0 %v305_v0  ;;  %v139_v12 = vsub.s32 0, %v138_v10  ;;  %s273_s18 = scalar_lea.vmem %s179_s3, 16  ;;  %s277_s19 = scalar_lea.vmem %s179_s3, 32 }
  0x2d   :  { %p274_p2 = scmp.ne.s32.totalorder %s179_s3, %s273_s18  ;;  %p278_p3 = scmp.lt.s32.totalorder %s179_s3, %s179_s3 }
  0x2e   :  { %p279_p4 = scmp.lt.s32.totalorder %s277_s19, %s273_s18 }
  0x30   :  { %p280_p5 = por %p279_p4, %p278_p3 }
  0x32   :  { %p281_p6 = pnand %p280_p5, %p274_p2 }
  0x33   :  { %216 = vmatpush3.bf16.xpose.msk.msra.mxu0 %vm211_vm2, %v214_v7 }
  0x3a   :  { %207 = vmatmul.mubr.msk.f32.vlgmr.msra.gmra.mrb[0].mxu0 %vm51_vm1, %v44_v8 }
 0x10d   :  { %v133_v13 = vpop.f32.mrb[0].mxu0 }
 0x10e   :  { %v134_v14 = vadd.f32 %v133_v13, %v49_v11  ;;  %v208_v15 = vpop.f32.mrb[1].mxu0 }
 0x110   :  { %v140_v17 = vrot.slane %v134_v14, %v139_v12 }
 0x112   :  { %v141_v18 = vmul.f32 %v140_v17, %v50_v16 }
 0x114   :  { %v142_v19 = vsel %vm51_vm1, %v141_v18, 0.0 }
 0x115   :  { %143 = vadd.xlane.f32.xlu0 %v142_v19 }
 0x1a2   :  { %v144_v20 = vpop.xlane.xlu0 %143 }
 0x1a3   :  { %v145_v21 = vrot.slane %v144_v20, 4 }
 0x1a5   :  { %v146_v22 = vmax.f32 %v144_v20, %v145_v21 }
 0x1a7   :  { %v147_v23 = vrot.slane %v146_v22, 2 }
 0x1a9   :  { %v148_v24 = vmax.f32 %v146_v22, %v147_v23 }
 0x1ab   :  { %v149_v25 = vrot.slane %v148_v24, 1 }
 0x1ad   :  { %v150_v26 = vmax.f32 %v148_v24, %v149_v25 }
 0x1af   :  { %v151_v27 = vsub.f32 %v144_v20, %v150_v26 }
 0x1b1   :  { %v152_v28 = vmul.f32 1.442695, %v151_v27 }
 0x1b3   :  { %225 = vpow2.f32 %v152_v28 }
 0x1bd   :  { %v226_v29 = vpop.eup %225 }
 0x1be   :  { %v154_v30 = vrot.slane %v226_v29, 4 }
 0x1c0   :  { %v155_v31 = vadd.f32 %v226_v29, %v154_v30 }
 0x1c2   :  { %v156_v32 = vrot.slane %v155_v31, 2 }
 0x1c4   :  { %v157_v33 = vadd.f32 %v156_v32, %v155_v31 }
 0x1c6   :  { %v158_v34 = vrot.slane %v157_v33, 1 }
 0x1c8   :  { %v159_v35 = vadd.f32 %v158_v34, %v157_v33 }
 0x1ca   :  { %227 = vrcp.f32 %v159_v35 }
 0x1d4   :  { %v228_v36 = vpop.eup %227 }
 0x1d5   :  { %v161_v37 = vmul.f32 %v228_v36, %v226_v29 }
 0x1d7   :  { %v162_v38 = vmul.f32 %v161_v37, %v50_v16 }
 0x1d9   :  { %v163_v39 = vsel %vm51_vm1, %v162_v38, 0.0 }
 0x1da   :  { %v164_v40 = vrot.slane %v163_v39, 4 }
 0x1dc   :  { %v165_v41 = vadd.f32 %v164_v40, %v163_v39 }
 0x1de   :  { %v166_v42 = vrot.slane %v165_v41, 2 }
 0x1e0   :  { %v167_v43 = vadd.f32 %v166_v42, %v165_v41 }
 0x1e2   :  { %v168_v44 = vrot.slane %v167_v43, 1 }
 0x1e4   :  { %v169_v45 = vadd.f32 %v168_v44, %v167_v43 }
 0x1e6   :  { %171 = vst.msk [vmem:[#allocation7] sm:$0x1] %vm170_vm3, %v169_v45 }
 0x1e7   :  { %284 = shalt.err (!%p281_p6)
}
 0x1e8   :  { %s285_s22 = scalar_lea.hbm %s392_s4, 16 }
 0x1e9   :  { %p286_p7 = scmp.ne.s32.totalorder %s392_s4, %s285_s22  ;;  %p289_p8 = scmp.lt.u32.totalorder %s285_s22, %s392_s4 }
 0x1eb   :  { %p291_p9 = pnand %p289_p8, %p286_p7 }
 0x1ed   :  { %294 = shalt.err (!%p291_p9)
}
 0x1ee   :  { %181 = dma.vmem_to_hbm [thread:$0]  %s179_s3, 16, %s392_s4, [#allocation4]  }
 0x1ef   :  { %299 = dma.done.wait [#allocation4], 16  }
 0x1f0   :  { %300 = vsyncadd [#allocation4], 4294967280 }
 0x1f1   :  { %185 = vsyncpa [#allocation3], 1 }
 0x1f2   :  { %186 = vsyncpa [#allocation6], 1 }
 0x1f3   :  { %187 = vsyncpa [#allocation4], 1 }

</bundles_post_ra>
